<compile_context>
chip_gen: v6e
topology: v6e:2x2x1
jax: 0.10.0
libtpu: 0.0.40
codegen_flags: <defaults>
</compile_context>

<pallas_src>
import math

import jax
import jax.numpy as jnp
from jax.experimental import pallas as pl
from jax.experimental.pallas import tpu as pltpu


def _identity_copy_kernel(x_ref, o_ref):
    # Elementwise copy of the current VMEM tile.
    o_ref[...] = x_ref[...]


def _vmem_capacity_bytes():
    """Best-effort per-core VMEM capacity query; defaults to 128 MiB."""
    try:
        info = pltpu.get_tpu_info()
        for name in ("vmem_capacity_bytes", "vmem_size_bytes", "vmem_bytes"):
            cap = getattr(info, name, None)
            if cap:
                return int(cap)
    except Exception:
        pass
    return 128 * 1024 * 1024


def _plan_rows_cols(shape):
    """Pick a free (rows, cols) 2-D presentation of a contiguous array.

    Never pads.  Preference order:
      (a/b) shortest trailing-suffix product that is a multiple of 128
            -> merge only that suffix (layout-safe metadata reshape),
      (c)   total is a multiple of 128
            -> flat re-split into lane-dense cols (only when (a/b) leaves too
               few rows to tile),
      (d)   ragged total
            -> keep the trailing extent as a full-extent (exempt) last dim and
               tile the leading dims; no padding, no trailing slice.
    """
    total = math.prod(shape) if shape else 1

    # (a)/(b): shortest 128-aligned trailing suffix.
    suffix = 1
    for d in reversed(shape):
        suffix *= d
        if suffix % 128 == 0:
            rows = total // suffix
            if rows >= 16:
                return rows, suffix
            break  # aligned but too few rows -> try the flat re-split below

    # (c): flat lane-dense re-split.
    if total % 128 == 0:
        for c in (4096, 2048, 1024, 512, 256, 128):
            if total % c == 0 and total // c >= 16:
                return total // c, c
        return total // 128, 128

    # (d): ragged -- full-extent trailing dim, tile leading dims.
    if len(shape) >= 2:
        return total // shape[-1], shape[-1]
    return total, 1


def _normalize_cols(rows, cols, itemsize, sublane, target_block_bytes):
    """If one sublane-strip of `cols` already blows the tile budget, re-split
    the (128-aligned) cols so blocks stay within budget (free for contiguous
    row-major data)."""
    if cols % 128 == 0 and cols * itemsize * sublane > target_block_bytes:
        for c in (8192, 4096, 2048, 1024, 512, 256, 128):
            if cols % c == 0 and c * itemsize * sublane <= target_block_bytes:
                return rows * (cols // c), c
    return rows, cols


def identity(x, *, use_pallas=True):
    """Identity forward pass.

    Default path runs a lane-dense, HBM-bandwidth-bound Pallas copy kernel.
    `use_pallas=False` is the zero-cost path (just returns x).
    """
    if not use_pallas:
        return x  # optimal: no kernel, no HBM round trip
    if x.size == 0:
        return x

    orig_shape = x.shape
    dtype = x.dtype
    itemsize = jnp.dtype(dtype).itemsize
    total = x.size

    # ---- Generation-aware tile / VMEM budgets ----
    vmem_cap = _vmem_capacity_bytes()
    if vmem_cap <= 80 * 1024 * 1024:           # v7x-class: 64 MiB VMEM per TC
        target_block_bytes = 4 * 1024 * 1024
        vmem_limit_cap = 32 * 1024 * 1024
    else:                                      # v5e / v6e: 128 MiB VMEM
        target_block_bytes = 8 * 1024 * 1024
        vmem_limit_cap = 48 * 1024 * 1024

    # dtype-aware sublane granularity (8 rows f32 / 16 bf16 / 32 int8).
    sublane = max(8, 32 // max(itemsize, 1))

    rows, cols = _plan_rows_cols(orig_shape)
    rows, cols = _normalize_cols(rows, cols, itemsize, sublane, target_block_bytes)

    # Metadata-only reshape for the default (row-major) layout; no pad, no slice.
    x2 = x.reshape(rows, cols)

    # ---- Row tiles near the target block size, sublane-rounded; guarantee
    #      >= 2 grid steps when legally possible (both v7x TCs pull from HBM).
    tile_rows = (target_block_bytes // max(cols * itemsize, 1)) // sublane * sublane
    tile_rows = max(sublane, tile_rows)
    if tile_rows >= rows:
        if rows >= 2 * sublane:
            half = -(-rows // 2)
            tile_rows = -(-half // sublane) * sublane
            if tile_rows >= rows:
                tile_rows = rows
        else:
            tile_rows = rows  # single full-extent block (exempt from the 8-rule)
    grid = (pl.cdiv(rows, tile_rows),)  # partial last block is masked, never padded

    # ---- Explicit VMEM budget: double-buffered (in + out) tiles + headroom ----
    tile_bytes = tile_rows * cols * itemsize
    vmem_limit = int(min(max(8 * tile_bytes, 4 * 1024 * 1024), vmem_limit_cap))

    out2 = pl.pallas_call(
        _identity_copy_kernel,
        out_shape=jax.ShapeDtypeStruct((rows, cols), dtype),
        grid=grid,
        in_specs=[pl.BlockSpec((tile_rows, cols), lambda i: (i, 0))],
        out_specs=pl.BlockSpec((tile_rows, cols), lambda i: (i, 0)),
        compiler_params=pltpu.CompilerParams(
            dimension_semantics=("parallel",),  # rows shard across 2 TCs on v7x
            vmem_limit_bytes=vmem_limit,
        ),
        cost_estimate=pl.CostEstimate(
            flops=0,
            transcendentals=0,
            bytes_accessed=int(2 * total * itemsize),
        ),
    )(x2)

    return out2.reshape(orig_shape)


# TODO(synk): the full PPGN forward (edge embedding, RegularBlock matmul stack,
# BatchNorm1d, output MLP) is outside this Identity submodule and is not
# translated here.


if __name__ == "__main__":
    key = jax.random.PRNGKey(0)

    # NCHW-shaped example input, consistent with PPGN's N x C x m x m tensors.
    x = jax.random.normal(key, (2, 4, 16, 16), dtype=jnp.float32)
    y = jax.block_until_ready(identity(x))
    assert y.shape == x.shape
    assert y.dtype == x.dtype
    assert bool(jnp.all(y == x))

    # Non-multiple-of-128 size: exercises the no-pad, full-extent-trailing-dim
    # path (previously the pad+slice fallback).
    x_ragged = jax.random.normal(jax.random.PRNGKey(1), (3, 5, 7), dtype=jnp.float32)
    y_ragged = jax.block_until_ready(identity(x_ragged))
    assert y_ragged.shape == x_ragged.shape
    assert bool(jnp.all(y_ragged == x_ragged))

    print("KERNEL_OK")
</pallas_src>

<mosaic_0001>
module attributes {stable_mosaic.version = 11 : i64} {
  func.func @_identity_copy_kernel(%arg0: i32, %arg1: memref<8x128xf32, #tpu.memory_space<vmem>>, %arg2: memref<8x128xf32, #tpu.memory_space<vmem>>) attributes {dimension_semantics = [#tpu.dimension_semantics<parallel>], iteration_bounds = array<i64: 2>, scalar_prefetch = 0 : i64, scratch_operands = 0 : i64, tpu.core_type = #tpu.core_type<tc>, window_params = [{transform_indices = @transform_0, window_bounds = array<i64: 8, 128>}, {transform_indices = @transform_1, window_bounds = array<i64: 8, 128>}]} {
    %c0 = arith.constant 0 : index
    %c0_0 = arith.constant 0 : index
    %0 = vector.load %arg1[%c0, %c0_0] : memref<8x128xf32, #tpu.memory_space<vmem>>, vector<8x128xf32>
    %c0_1 = arith.constant 0 : index
    %c0_2 = arith.constant 0 : index
    %1 = vector.load %arg2[%c0_1, %c0_2] : memref<8x128xf32, #tpu.memory_space<vmem>>, vector<8x128xf32>
    tpu.vector_store %arg2[%c0_1, %c0_2], %0 {strides = array<i32>} : memref<8x128xf32, #tpu.memory_space<vmem>>, vector<8x128xf32>,
    return
  }
  func.func @transform_0(%arg0: i32) -> (i32, i32) {
    %c0_i32 = arith.constant 0 : i32
    %c0_i32_0 = arith.constant 0 : i32
    return %arg0, %c0_i32 : i32, i32
  }
  func.func @transform_1(%arg0: i32) -> (i32, i32) {
    %c0_i32 = arith.constant 0 : i32
    %c0_i32_0 = arith.constant 0 : i32
    return %arg0, %c0_i32 : i32, i32
  }
}

</mosaic_0001>

<bundles_post_ra>
// kernel: tpu_custom_call.1
= control target key start
LH: loop header
LB: loop body
LE: loop exit
PB: predicated region body
PF: predicated region fallthrough
CT: control target
= control target key end

     0   :  { %6 = vsyncpa [#allocation3], 0  ;;  %s529_s0 = inlined_call_operand.hbm [shape: f32[16,128], index: 0, kind: input, shape index: {}]   ;;  %s530_s1 = inlined_call_operand.hbm [shape: f32[16,128], index: 1, kind: output, shape index: {}]  }
   0x1   :  { %8 = vsyncpa [#allocation3 + $0x1], 0 }
   0x2   :  { %9 = vsyncpa [#allocation4], 0 }
   0x3   :  { %11 = vsyncpa [#allocation4 + $0x1], 0  ;;  %s382_s6 = smov 0   ;;  %s384_s7 = smov 0  }
   0x4   :  { %s386_s8 = smov 0   ;;  %s388_s9 = smov 0  }
   0x5 LB: > { %s403_s10 = sadd.s32 4294967295, %s368_s9   ;;  %s218_s11 = sadd.s32 4294967294, %s368_s9   ;;  %s368_s9 = sphi %s388_s9, %s547_s9   ;;  %s364_s8 = sphi %s386_s8, %s546_s8   ;;  %s360_s7 = sphi %s384_s7, %s545_s7   ;;  %s356_s6 = sphi %s382_s6, %s544_s6  }
   0x6   : > { %s407_s12 = sadd.s32 1, %s368_s9   ;;  %s24_s13 = sadd.s32 1, %s364_s8 }
   0x7   : > { %s21_s14 = ssub.s32 %s368_s9, %s407_s12  ;;  %p31_p0 = scmp.ne.s32.totalorder %s364_s8, %s360_s7 }
   0x8   : > { %p22_p1 = scmp.eq.s32.totalorder %s21_s14, 0  ;;  %p32_p2 = scmp.eq.s32.totalorder %s368_s9, 0 }
   0x9   : > { %p37_p3 = scmp.ne.s32.totalorder %s360_s7, %s356_s6  ;;  %p38_p4 = scmp.eq.s32.totalorder %s403_s10, 0 }
   0xa   : > { %s419_s15 = scalar_select %p22_p1, %s364_s8, %s24_s13  }
   0xb   : > { %p421_p5 = por %p32_p2, %p31_p0  ;;  %p425_p6 = por %p38_p4, %p37_p3 }
   0xc   : > { %p61_p7 = scmp.eq.s32.totalorder %s403_s10, 1  ;;  %p67_p8 = scmp.eq.s32.totalorder %s218_s11, 1 }
   0xd   : > { %s534_s17 = scalar_select %p425_p6, 1, 0 }
   0xe   : > { %p242_p10 = scmp.lt.s32.totalorder %s368_s9, 2  ;;  %p432_p11 = por %p61_p7, %p31_p0 }
   0xf   : > { %p436_p12 = por %p67_p8, %p37_p3  ;;  %s87_s20 = sand.u32 1, %s364_s8  }
  0x10   : > { %s535_s18 = scalar_select %p432_p11, 1, 0 }
  0x11   : > { %s536_s19 = scalar_select %p436_p12, 1, 0 }
  0x12   : > { %s222_s21 = sshll.u32 %s368_s9, 7  ;;  %s221_s22 = sshll.u32 %s87_s20, 3 }
  0x13   : > { %s445_s25 = scalar_lea.hbm %s529_s0, %s222_s21  ;;  %s91_s26 = scalar_lea.vmem [#allocation2], %s221_s22 }
  0x14   : > { %s98_s27 = sshll.u32 %s91_s26, 4  ;;  %p449_p13 = pnand %p242_p10, %p421_p5  ;;  %s453_s27 = int_to_ptr.vmem [resolvable:$true] %s98_s27 }
  0x15   : > { %s88_s29 = scalar_lea.sflag [#allocation3], %s87_s20  ;;  %s276_s30 = scalar_lea.hbm %s445_s25, 128 }
  0x16   : > { %p277_p2 = scmp.ne.s32.totalorder %s445_s25, %s276_s30  ;;  %p278_p3 = pneg %p449_p13 }
  0x17   : > { %s281_s4 = scalar_lea.hbm %s529_s0, 256  ;;  %p282_p5 = scmp.lt.s32.totalorder %s445_s25, %s529_s0 }
  0x18   : > { %p279_p4 = pnand %p278_p3, %p277_p2  ;;  %p283_p8 = scmp.lt.s32.totalorder %s281_s4, %s276_s30 }
  0x1a   : > { %p280_p7 = pneg %p279_p4  ;;  %p284_p10 = por %p283_p8, %p282_p5 }
  0x1c   : > { %p285_p9 = pnand %p284_p10, %p280_p7 }
  0x1e   : > { %288 = shalt.err (!%p285_p9)
}
  0x1f   : > { %s289_s13 = scalar_lea.vmem %s453_s27, 128  ;;  %s370_s14 = smov [#allocation2]  }
  0x20   : > { %p290_p0 = scmp.ne.s32.totalorder %s453_s27, %s289_s13  ;;  %s294_s16 = sshll.u32 %s370_s14, 4  ;;  %s295_s16 = int_to_ptr.vmem [resolvable:$false] %s294_s16 }
  0x21   : > { %s296_s20 = scalar_lea.vmem %s295_s16, 256  ;;  %p297_p4 = scmp.lt.s32.totalorder %s453_s27, %s295_s16 }
  0x22   : > { %p292_p1 = pnand %p290_p0, %p278_p3  ;;  %p298_p12 = scmp.lt.s32.totalorder %s296_s20, %s289_s13 }
  0x24   : > { %p293_p2 = pneg %p292_p1  ;;  %p299_p11 = por %p298_p12, %p297_p4 }
  0x26   : > { %p300_p6 = pnand %p299_p11, %p293_p2 }
  0x28   : > { %303 = shalt.err (!%p300_p6)
}
  0x29   : > { %237 = dma.hbm_to_vmem [thread:$0]  (!%p449_p13), %s445_s25, 128, %s453_s27, %s88_s29  }
  0x2a   : > { %p538_p9 = scmp.lt.s32.totalorder %s368_s9, 3  ;;  %p539_p7 = scmp.ge.s32.totalorder %s368_s9, 1 }
  0x2c   : > { %p104_p0 = pnand %p539_p7, %p538_p9 }
  0x2d   : > { %s480_s21 = sand.u32 (!%p104_p0), 1, %s360_s7   ;;  %p540_p6 = scmp.ne.s32.totalorder (!%p104_p0), %s534_s17, 0 }
  0x2e   : > { %107 = sbr.rel (%p104_p0) target bundleno = 77 (0x4d), region = 24  ;;  %s224_s22 = sshll.u32 (!%p104_p0), %s480_s21, 3 }
  0x2f   : > { %s110_s23 = scalar_lea.sflag (!%p104_p0), [#allocation3], %s480_s21  ;;  %s113_s24 = scalar_lea.vmem (!%p104_p0), [#allocation2], %s224_s22 }
  0x33   : > { %347 = dma.done.wait (%p540_p6), %s110_s23, 128  }
  0x34   : > { %349 = vsyncadd (%p540_p6), %s110_s23, 4294967168  ;;  %s131_s25 = scalar_lea.vmem [#allocation5], %s224_s22  ;;  %s227_s27 = sshll.u32 %s403_s10, 7  ;;  %v132_v0 = vld [vmem:[%s113_s24] sm:$0xff] }
  0x35   : > { %s148_s26 = sshll.u32 %s131_s25, 4  ;;  %s146_s30 = scalar_lea.hbm %s530_s1, %s227_s27  ;;  %133 = vst [vmem:[%s131_s25] sm:$0xff] %v132_v0  ;;  %s489_s26 = int_to_ptr.vmem [resolvable:$true] %s148_s26 }
  0x36   : > { %s135_s2 = scalar_lea.sflag [#allocation4], %s480_s21  ;;  %s304_s17 = scalar_lea.vmem %s489_s26, 128 }
  0x37   : > { %p305_p11 = scmp.ne.s32.totalorder %s489_s26, %s304_s17  ;;  %p541_p12 = scmp.ne.s32.totalorder %s535_s18, 0 }
  0x38   : > { %s371_s3 = smov [#allocation5]  }
  0x39   : > { %p306_p13 = pnand %p305_p11, %p541_p12  ;;  %s308_s4 = sshll.u32 %s371_s3, 4  ;;  %s309_s4 = int_to_ptr.vmem [resolvable:$false] %s308_s4 }
  0x3a   : > { %s310_s10 = scalar_lea.vmem %s309_s4, 256  ;;  %p311_p3 = scmp.lt.s32.totalorder %s489_s26, %s309_s4 }
  0x3b   : > { %p307_p1 = pneg %p306_p13  ;;  %p312_p5 = scmp.lt.s32.totalorder %s310_s10, %s304_s17 }
  0x3d   : > { %p313_p8 = por %p312_p5, %p311_p3 }
  0x3f   : > { %p314_p10 = pnand %p313_p8, %p307_p1 }
  0x41   : > { %317 = shalt.err (!%p314_p10)
}
  0x42   : > { %s318_s5 = scalar_lea.hbm %s146_s30, 128  ;;  %s322_s14 = scalar_lea.hbm %s530_s1, 256 }
  0x43   : > { %p319_p2 = scmp.ne.s32.totalorder %s146_s30, %s318_s5  ;;  %p323_p7 = scmp.lt.s32.totalorder %s146_s30, %s530_s1 }
  0x44   : > { %p324_p0 = scmp.lt.s32.totalorder %s322_s14, %s318_s5 }
  0x45   : > { %p320_p4 = pnand %p319_p2, %p541_p12 }
  0x46   : > { %p325_p6 = por %p324_p0, %p323_p7 }
  0x47   : > { %p321_p9 = pneg %p320_p4 }
  0x49   : > { %p326_p11 = pnand %p325_p6, %p321_p9 }
  0x4b   : > { %329 = shalt.err (!%p326_p11)
}
  0x4c   : > { %232 = dma.vmem_to_hbm [thread:$0]  (%p541_p12), %s489_s26, 128, %s146_s30, %s135_s2  }
  0x4d PF: > { %s160_s21 = sand.u32 1, %s356_s6   ;;  %p542_p13 = scmp.ne.s32.totalorder %s536_s19, 0 }
  0x4e   : > { %p543_p1 = scmp.ge.s32.totalorder %s368_s9, 2  ;;  %s161_s22 = scalar_lea.sflag [#allocation4], %s160_s21 }
  0x50   : > { %p239_p3 = pnand %p543_p1, %p542_p13 }
  0x52   : > { %p240_p5 = pneg %p239_p3 }
  0x54   : > { %351 = dma.done.wait (%p240_p5), %s161_s22, 128  }
  0x55   : > { %353 = vsyncadd (%p240_p5), %s161_s22, 4294967168  ;;  %p14_p8 = scmp.ge.s32.totalorder %s407_s12, 4   ;;  %s544_s6 = smov %s360_s7 }
  0x56   : > { %s545_s7 = smov %s364_s8  ;;  %s546_s8 = smov %s419_s15 }
  0x57   : > { %s547_s9 = smov %s407_s12  ;;  %16 = sbr.rel (!%p14_p8) target bundleno = 5 (0x5), region = 69 }
  0x5c   :  { %166 = vsyncpa [#allocation3], 1 }
  0x5d   :  { %168 = vsyncpa [#allocation3 + $0x1], 1 }
  0x5e   :  { %169 = vsyncpa [#allocation4], 1 }
  0x5f   :  { %171 = vsyncpa [#allocation4 + $0x1], 1 }

</bundles_post_ra>
